<compile_context>
chip_gen: v7x
topology: tpu7x:2x2x1
jax: 0.10.0
libtpu: 0.0.40
codegen_flags: <defaults>
</compile_context>

<pallas_src>
import math
import functools

import jax
import jax.numpy as jnp
from jax import lax
from jax.experimental import pallas as pl
from jax.experimental.pallas import tpu as pltpu


_VMEM_BUDGET = 40 * 1024 * 1024  # conservative double-buffered cap (v7x: 64 MiB/TC)


def _round_up(n, m):
    return ((n + m - 1) // m) * m


def _choose_tile_c(C, cap):
    """Pick a lane-aligned (multiple of 128) class tile.

    If C is already a multiple of 128, pick a divisor of C so no weight
    padding and no output slice pass is needed.  Returns (tile_c, Cp)."""
    cap = max(128, (cap // 128) * 128)
    if C % 128 == 0:
        units = C // 128
        for u in range(min(units, cap // 128), 0, -1):
            if units % u == 0:
                return u * 128, C
        return 128, C
    tile_c = min(cap, _round_up(C, 128))
    return tile_c, _round_up(C, tile_c)


def _normalize_rows(v):
    # F.normalize(v, dim=-1) == v / max(||v||, 1e-12), in rsqrt form.
    return v * lax.rsqrt(jnp.maximum(jnp.sum(v * v, axis=-1, keepdims=True),
                                     jnp.float32(1e-24)))


def _arc_epilogue(cosine, label_col, col0, *, scale, cos_m, sin_m, th, mm,
                  ls_eps, easy_margin, out_features):
    """ArcFace margin + one-hot select on an f32 cosine tile.

    `scale` is pre-folded into the margin constants (no trailing full-tile
    multiply); sqrt argument uses maximum(., 0) only (1 - c^2 <= 1 always)."""
    tb, tc = cosine.shape
    sine = jnp.sqrt(jnp.maximum(1.0 - cosine * cosine, 0.0))
    cos_s = cosine * jnp.float32(scale)
    phi_s = (cosine * jnp.float32(scale * cos_m)
             - sine * jnp.float32(scale * sin_m))
    if easy_margin:
        phi_s = jnp.where(cosine > 0.0, phi_s, cos_s)
    else:
        phi_s = jnp.where(cosine > jnp.float32(th), phi_s,
                          cos_s - jnp.float32(scale * mm))
    class_ids = col0 + lax.broadcasted_iota(jnp.int32, (tb, tc), 1)
    is_target = class_ids == label_col                    # (tb, tc) bool
    if ls_eps > 0.0:
        one_hot = (jnp.float32(1.0 - ls_eps) * is_target.astype(jnp.float32)
                   + jnp.float32(ls_eps / out_features))
        return cos_s + one_hot * (phi_s - cos_s)
    return jnp.where(is_target, phi_s, cos_s)


def _arc_kernel_resident_x(x_ref, w_ref, label_ref, out_ref, *, scale, cos_m,
                           sin_m, th, mm, ls_eps, easy_margin, out_features):
    # Path A: 1-D grid over C tiles.
    #   x_ref     (Bp, D)       bf16 pre-normalized rows, resident
    #   w_ref     (tile_c, D)   f32 RAW weight rows (streamed once, normalized here)
    #   label_ref (Bp, 1)       int32, resident
    #   out_ref   (Bp, tile_c)  f32
    w = w_ref[...]
    wn = (w * lax.rsqrt(jnp.maximum(jnp.sum(w * w, axis=-1, keepdims=True),
                                    jnp.float32(1e-24)))).astype(jnp.bfloat16)
    # NT matmul (contract both last dims): native MXU orientation, no transpose.
    cosine = lax.dot_general(x_ref[...], wn,
                             dimension_numbers=(((1,), (1,)), ((), ())),
                             preferred_element_type=jnp.float32)
    col0 = pl.program_id(0) * out_ref.shape[1]
    out_ref[...] = _arc_epilogue(cosine, label_ref[...], col0, scale=scale,
                                 cos_m=cos_m, sin_m=sin_m, th=th, mm=mm,
                                 ls_eps=ls_eps, easy_margin=easy_margin,
                                 out_features=out_features)


def _arc_kernel_tiled(x_ref, w_ref, label_ref, out_ref, wn_ref, *, scale,
                      cos_m, sin_m, th, mm, ls_eps, easy_margin, out_features):
    # Path B: grid = (C tiles [outer, parallel], B tiles [inner, arbitrary]).
    # The raw f32 weight tile is resident across the inner axis: normalize it
    # into the bf16 scratch exactly once per outer step.
    i = pl.program_id(1)

    @pl.when(i == 0)
    def _():
        w = w_ref[...]
        wn_ref[...] = (w * lax.rsqrt(
            jnp.maximum(jnp.sum(w * w, axis=-1, keepdims=True),
                        jnp.float32(1e-24)))).astype(jnp.bfloat16)

    cosine = lax.dot_general(x_ref[...], wn_ref[...],
                             dimension_numbers=(((1,), (1,)), ((), ())),
                             preferred_element_type=jnp.float32)
    col0 = pl.program_id(0) * out_ref.shape[1]
    out_ref[...] = _arc_epilogue(cosine, label_ref[...], col0, scale=scale,
                                 cos_m=cos_m, sin_m=sin_m, th=th, mm=mm,
                                 ls_eps=ls_eps, easy_margin=easy_margin,
                                 out_features=out_features)


def arc_margin_product(x, weight, label, *, scale=30.0, margin=0.5,
                       easy_margin=False, ls_eps=0.0,
                       tile_b=256, tile_c=2048, force_tiled=False):
    """x: (B, in_features) f32, weight: (out_features, in_features) f32,
    label: (B,) int -> (B, out_features) f32 ArcFace logits."""
    x = jnp.asarray(x, jnp.float32)
    weight = jnp.asarray(weight, jnp.float32)
    B, D = x.shape
    C, D2 = weight.shape
    assert D == D2

    # x is the small operand: normalize + cast to bf16 once in the wrapper.
    xn = _normalize_rows(x).astype(jnp.bfloat16)
    label = jnp.asarray(label, jnp.int32).reshape(B, 1)

    margin_kwargs = dict(
        scale=float(scale), cos_m=math.cos(margin), sin_m=math.sin(margin),
        th=math.cos(math.pi - margin), mm=math.sin(math.pi - margin) * margin,
        ls_eps=float(ls_eps), easy_margin=bool(easy_margin), out_features=C)

    def fp_resident(tc):  # double-buffered VMEM footprint, Path A
        return (2 * B * D * 2 + 2 * B * 4          # x (bf16), labels
                + 2 * tc * D * 4 + tc * D * 2      # raw f32 W tile + bf16 copy
                + 2 * B * tc * 4)                  # f32 output tile

    def fp_tiled(tb, tc):  # double-buffered VMEM footprint, Path B
        return (2 * tb * D * 2 + 2 * tb * 4
                + 2 * tc * D * 4 + tc * D * 2      # W tile + bf16 scratch
                + 2 * tb * tc * 4)

    tile_c_req = tile_c
    tile_c, Cp = _choose_tile_c(C, tile_c_req)

    use_resident = not force_tiled
    if use_resident:
        while fp_resident(tile_c) > _VMEM_BUDGET and tile_c > 128:
            tile_c, Cp = _choose_tile_c(C, tile_c // 2)
        use_resident = fp_resident(tile_c) <= _VMEM_BUDGET

    if not use_resident:
        tile_c, Cp = _choose_tile_c(C, tile_c_req)
        tile_b = max(16, min(_round_up(tile_b, 16), _round_up(B, 16)))
        while fp_tiled(tile_b, tile_c) > _VMEM_BUDGET and tile_c > 128:
            tile_c, Cp = _choose_tile_c(C, tile_c // 2)
        while fp_tiled(tile_b, tile_c) > _VMEM_BUDGET and tile_b > 16:
            tile_b = max(16, ((tile_b // 2) // 16) * 16)

    footprint = fp_resident(tile_c) if use_resident else fp_tiled(tile_b, tile_c)
    compiler_kwargs = {}
    if footprint > 12 * 1024 * 1024:  # may exceed scoped-VMEM defaults (16 MiB v5e)
        compiler_kwargs["vmem_limit_bytes"] = int(
            min(footprint + (8 << 20), 48 * 1024 * 1024))

    if Cp != C:  # only pad W when C is not lane-tileable (rare path)
        weight = jnp.pad(weight, ((0, Cp - C), (0, 0)))

    if use_resident:
        # ---- Path A: x/labels resident, 1-D grid over C tiles ----
        Bp = _round_up(B, 16)  # bf16 packs two rows per sublane
        xb, lb = xn, label
        if Bp != B:
            xb = jnp.pad(xn, ((0, Bp - B), (0, 0)))
            lb = jnp.pad(label, ((0, Bp - B), (0, 0)), constant_values=-1)

        kernel = functools.partial(_arc_kernel_resident_x, **margin_kwargs)
        out = pl.pallas_call(
            kernel,
            out_shape=jax.ShapeDtypeStruct((Bp, Cp), jnp.float32),
            grid=(Cp // tile_c,),
            in_specs=[
                pl.BlockSpec((Bp, D), lambda j: (0, 0)),       # x (resident)
                pl.BlockSpec((tile_c, D), lambda j: (j, 0)),   # raw W rows (once)
                pl.BlockSpec((Bp, 1), lambda j: (0, 0)),       # labels (resident)
            ],
            out_specs=pl.BlockSpec((Bp, tile_c), lambda j: (0, j)),
            compiler_params=pltpu.CompilerParams(
                dimension_semantics=("parallel",), **compiler_kwargs),
        )(xb, weight, lb)
        return out[:B, :C] if (Bp != B or Cp != C) else out

    # ---- Path B: 2-D grid, C tiles OUTER so W is resident across B tiles ----
    Bp = _round_up(B, tile_b)
    xb, lb = xn, label
    if Bp != B:
        xb = jnp.pad(xn, ((0, Bp - B), (0, 0)))
        lb = jnp.pad(label, ((0, Bp - B), (0, 0)), constant_values=-1)

    kernel = functools.partial(_arc_kernel_tiled, **margin_kwargs)
    out = pl.pallas_call(
        kernel,
        out_shape=jax.ShapeDtypeStruct((Bp, Cp), jnp.float32),
        grid=(Cp // tile_c, Bp // tile_b),
        in_specs=[
            pl.BlockSpec((tile_b, D), lambda j, i: (i, 0)),    # x rows
            pl.BlockSpec((tile_c, D), lambda j, i: (j, 0)),    # W rows, resident over i
            pl.BlockSpec((tile_b, 1), lambda j, i: (i, 0)),    # labels
        ],
        out_specs=pl.BlockSpec((tile_b, tile_c), lambda j, i: (i, j)),
        scratch_shapes=[pltpu.VMEM((tile_c, D), jnp.bfloat16)],
        compiler_params=pltpu.CompilerParams(
            dimension_semantics=("parallel", "arbitrary"), **compiler_kwargs),
    )(xb, weight, lb)
    return out[:B, :C] if (Bp != B or Cp != C) else out


def _xavier_uniform(key, out_features, in_features):
    a = math.sqrt(6.0 / (in_features + out_features))
    return jax.random.uniform(key, (out_features, in_features),
                              dtype=jnp.float32, minval=-a, maxval=a)


def _reference(x, w, label, scale, margin, easy_margin, ls_eps, bf16_matmul):
    """Pure-JAX reference; bf16_matmul=True mirrors the kernel's MXU dtype."""
    xn = x / jnp.maximum(jnp.linalg.norm(x, axis=1, keepdims=True), 1e-12)
    wn = w / jnp.maximum(jnp.linalg.norm(w, axis=1, keepdims=True), 1e-12)
    if bf16_matmul:
        cosine = jnp.dot(xn.astype(jnp.bfloat16), wn.astype(jnp.bfloat16).T,
                         preferred_element_type=jnp.float32)
    else:
        cosine = xn @ wn.T
    sine = jnp.sqrt(jnp.clip(1.0 - cosine ** 2, 0.0, 1.0))
    phi = cosine * math.cos(margin) - sine * math.sin(margin)
    if easy_margin:
        phi = jnp.where(cosine > 0.0, phi, cosine)
    else:
        phi = jnp.where(cosine > math.cos(math.pi - margin), phi,
                        cosine - math.sin(math.pi - margin) * margin)
    one_hot = jax.nn.one_hot(label, w.shape[0], dtype=jnp.float32)
    if ls_eps > 0:
        one_hot = (1.0 - ls_eps) * one_hot + ls_eps / w.shape[0]
    return (one_hot * phi + (1.0 - one_hot) * cosine) * scale


if __name__ == "__main__":
    B, in_features, out_features = 16, 128, 512
    key = jax.random.PRNGKey(0)
    kx, kw, kl = jax.random.split(key, 3)
    x = jax.random.normal(kx, (B, in_features), dtype=jnp.float32)
    weight = _xavier_uniform(kw, out_features, in_features)
    label = jax.random.randint(kl, (B,), 0, out_features, dtype=jnp.int32)

    # 1) Path A (resident x, 1-D grid over C tiles), default margin path
    out = arc_margin_product(x, weight, label, scale=30.0, margin=0.5,
                             easy_margin=False, ls_eps=0.0, tile_c=128)
    jax.block_until_ready(out)
    ref_bf16 = _reference(x, weight, label, 30.0, 0.5, False, 0.0, True)
    ref_f32 = _reference(x, weight, label, 30.0, 0.5, False, 0.0, False)
    assert out.shape == (B, out_features)
    assert jnp.allclose(out, ref_bf16, atol=5e-3, rtol=1e-3), \
        "mismatch vs bf16-consistent reference"
    assert jnp.allclose(out, ref_f32, atol=0.3), \
        "mismatch vs full-f32 reference (beyond bf16 tolerance)"

    # 2) Path A, easy_margin + label smoothing
    out2 = arc_margin_product(x, weight, label, scale=30.0, margin=0.5,
                              easy_margin=True, ls_eps=0.1, tile_c=128)
    jax.block_until_ready(out2)
    ref2 = _reference(x, weight, label, 30.0, 0.5, True, 0.1, True)
    assert jnp.allclose(out2, ref2, atol=1e-2, rtol=1e-3), \
        "mismatch vs reference (ls_eps / easy_margin path)"

    # 3) Path B (2-D grid, W tile resident across the inner B axis)
    B3 = 32
    x3 = jax.random.normal(jax.random.PRNGKey(1), (B3, in_features), jnp.float32)
    label3 = jax.random.randint(jax.random.PRNGKey(2), (B3,), 0, out_features,
                                dtype=jnp.int32)
    out3 = arc_margin_product(x3, weight, label3, scale=30.0, margin=0.5,
                              easy_margin=False, ls_eps=0.0,
                              tile_b=16, tile_c=128, force_tiled=True)
    jax.block_until_ready(out3)
    ref3 = _reference(x3, weight, label3, 30.0, 0.5, False, 0.0, True)
    assert jnp.allclose(out3, ref3, atol=5e-3, rtol=1e-3), \
        "mismatch vs reference (tiled 2-D grid path)"

    # 4) ragged class count (C not a multiple of 128 -> padded + sliced)
    C4 = 200
    w4 = _xavier_uniform(jax.random.PRNGKey(3), C4, in_features)
    label4 = jax.random.randint(jax.random.PRNGKey(4), (B,), 0, C4,
                                dtype=jnp.int32)
    out4 = arc_margin_product(x, w4, label4, scale=30.0, margin=0.5,
                              easy_margin=False, ls_eps=0.0, tile_c=256)
    jax.block_until_ready(out4)
    ref4 = _reference(x, w4, label4, 30.0, 0.5, False, 0.0, True)
    assert out4.shape == (B, C4)
    assert jnp.allclose(out4, ref4, atol=5e-3, rtol=1e-3), \
        "mismatch vs reference (ragged C path)"

    print("KERNEL_OK")
</pallas_src>

<mosaic_0001>
module attributes {stable_mosaic.version = 11 : i64} {
  func.func @_arc_kernel_resident_x(%arg0: i32, %arg1: memref<16x128xbf16, #tpu.memory_space<vmem>>, %arg2: memref<128x128xf32, #tpu.memory_space<vmem>>, %arg3: memref<16x1xi32, #tpu.memory_space<vmem>>, %arg4: memref<16x128xf32, #tpu.memory_space<vmem>>) attributes {dimension_semantics = [#tpu.dimension_semantics<parallel>], iteration_bounds = array<i64: 4>, scalar_prefetch = 0 : i64, scratch_operands = 0 : i64, tpu.core_type = #tpu.core_type<tc>, window_params = [{pipeline_mode = #tpu.pipeline_mode<synchronous>, transform_indices = @transform_0, window_bounds = array<i64: 16, 128>}, {transform_indices = @transform_1, window_bounds = array<i64: 128, 128>}, {pipeline_mode = #tpu.pipeline_mode<synchronous>, transform_indices = @transform_2, window_bounds = array<i64: 16, 1>}, {transform_indices = @transform_3, window_bounds = array<i64: 16, 128>}]} {
    %c0 = arith.constant 0 : index
    %c0_0 = arith.constant 0 : index
    %0 = vector.load %arg2[%c0, %c0_0] : memref<128x128xf32, #tpu.memory_space<vmem>>, vector<128x128xf32>
    %1 = arith.mulf %0, %0 : vector<128x128xf32>
    %cst = arith.constant dense<0.000000e+00> : vector<128xf32>
    %2 = vector.multi_reduction <add>, %1, %cst [1] : vector<128x128xf32> to vector<128xf32>
    %3 = vector.shape_cast %2 : vector<128xf32> to vector<128x1xf32>
    %cst_1 = arith.constant 1.000000e-24 : f32
    %4 = vector.broadcast %cst_1 : f32 to vector<128x1xf32>
    %5 = arith.maximumf %3, %4 : vector<128x1xf32>
    %6 = math.rsqrt %5 : vector<128x1xf32>
    %7 = vector.broadcast %6 : vector<128x1xf32> to vector<128x128xf32>
    %8 = arith.mulf %0, %7 : vector<128x128xf32>
    %9 = arith.truncf %8 : vector<128x128xf32> to vector<128x128xbf16>
    %c0_2 = arith.constant 0 : index
    %c0_3 = arith.constant 0 : index
    %10 = vector.load %arg1[%c0_2, %c0_3] : memref<16x128xbf16, #tpu.memory_space<vmem>>, vector<16x128xbf16>
    %cst_4 = arith.constant dense<0.000000e+00> : vector<16x128xf32>
    %11 = tpu.matmul %10, %9, %cst_4 {dimension_numbers = #tpu.dot_dimension_numbers<[1], [1], [0], [0], [0, 0, 1, 0], [], []>} : vector<16x128xbf16>, vector<128x128xbf16>, vector<16x128xf32> -> vector<16x128xf32>
    %c128_i32 = arith.constant 128 : i32
    %12 = arith.muli %arg0, %c128_i32 : i32
    %c0_5 = arith.constant 0 : index
    %c0_6 = arith.constant 0 : index
    %13 = vector.load %arg3[%c0_5, %c0_6] : memref<16x1xi32, #tpu.memory_space<vmem>>, vector<16x1xi32>
    %14 = arith.mulf %11, %11 : vector<16x128xf32>
    %cst_7 = arith.constant 1.000000e+00 : f32
    %15 = vector.broadcast %cst_7 : f32 to vector<16x128xf32>
    %16 = arith.subf %15, %14 : vector<16x128xf32>
    %cst_8 = arith.constant 0.000000e+00 : f32
    %17 = vector.broadcast %cst_8 : f32 to vector<16x128xf32>
    %18 = arith.maximumf %16, %17 : vector<16x128xf32>
    %19 = math.sqrt %18 : vector<16x128xf32>
    %cst_9 = arith.constant 3.000000e+01 : f32
    %20 = vector.broadcast %cst_9 : f32 to vector<16x128xf32>
    %21 = arith.mulf %11, %20 : vector<16x128xf32>
    %cst_10 = arith.constant 26.3274765 : f32
    %22 = vector.broadcast %cst_10 : f32 to vector<16x128xf32>
    %23 = arith.mulf %11, %22 : vector<16x128xf32>
    %cst_11 = arith.constant 14.3827658 : f32
    %24 = vector.broadcast %cst_11 : f32 to vector<16x128xf32>
    %25 = arith.mulf %19, %24 : vector<16x128xf32>
    %26 = arith.subf %23, %25 : vector<16x128xf32>
    %cst_12 = arith.constant -0.87758255 : f32
    %27 = vector.broadcast %cst_12 : f32 to vector<16x128xf32>
    %28 = arith.cmpf ogt, %11, %27 : vector<16x128xf32>
    %cst_13 = arith.constant 7.19138288 : f32
    %29 = vector.broadcast %cst_13 : f32 to vector<16x128xf32>
    %30 = arith.subf %21, %29 : vector<16x128xf32>
    %31 = arith.select %28, %26, %30 : vector<16x128xi1>, vector<16x128xf32>
    %32 = tpu.iota {dimensions = array<i32: 1>} : vector<16x128xi32>
    %33 = vector.broadcast %12 : i32 to vector<16x128xi32>
    %34 = arith.addi %33, %32 : vector<16x128xi32>
    %35 = vector.broadcast %13 : vector<16x1xi32> to vector<16x128xi32>
    %36 = arith.cmpi eq, %34, %35 : vector<16x128xi32>
    %37 = arith.select %36, %31, %21 : vector<16x128xi1>, vector<16x128xf32>
    %c0_14 = arith.constant 0 : index
    %c0_15 = arith.constant 0 : index
    %38 = vector.load %arg4[%c0_14, %c0_15] : memref<16x128xf32, #tpu.memory_space<vmem>>, vector<16x128xf32>
    tpu.vector_store %arg4[%c0_14, %c0_15], %37 {strides = array<i32>} : memref<16x128xf32, #tpu.memory_space<vmem>>, vector<16x128xf32>,
    return
  }
  func.func @transform_0(%arg0: i32) -> (i32, i32) {
    %c0_i32 = arith.constant 0 : i32
    %c0_i32_0 = arith.constant 0 : i32
    %c0_i32_1 = arith.constant 0 : i32
    return %c0_i32, %c0_i32_0 : i32, i32
  }
  func.func @transform_1(%arg0: i32) -> (i32, i32) {
    %c0_i32 = arith.constant 0 : i32
    %c0_i32_0 = arith.constant 0 : i32
    return %arg0, %c0_i32 : i32, i32
  }
  func.func @transform_2(%arg0: i32) -> (i32, i32) {
    %c0_i32 = arith.constant 0 : i32
    %c0_i32_0 = arith.constant 0 : i32
    %c0_i32_1 = arith.constant 0 : i32
    return %c0_i32, %c0_i32_0 : i32, i32
  }
  func.func @transform_3(%arg0: i32) -> (i32, i32) {
    %c0_i32 = arith.constant 0 : i32
    %c0_i32_0 = arith.constant 0 : i32
    return %c0_i32, %arg0 : i32, i32
  }
}

</mosaic_0001>

<bundles_post_ra>
// kernel: tpu_custom_call.1
= control target key start
LH: loop header
LB: loop body
LE: loop exit
PB: predicated region body
PF: predicated region fallthrough
CT: control target
= control target key end

     0   :  { %8 = vsyncpa [#allocation3], 0  ;;  %s1048_s0 = inlined_call_operand.vmem [shape: bf16[16,128], index: 0, kind: input, shape index: {}]   ;;  %s1049_s1 = inlined_call_operand.hbm [shape: f32[512,128], index: 1, kind: input, shape index: {}]   ;;  %s1050_s2 = inlined_call_operand.vmem [shape: s32[16,1], index: 2, kind: input, shape index: {}]   ;;  %s1051_s3 = inlined_call_operand.hbm [shape: f32[16,512], index: 3, kind: output, shape index: {}]  }
   0x1   :  { %10 = vsyncpa [#allocation3 + $0x1], 0 }
   0x2   :  { %11 = vsyncpa [#allocation4], 0 }
   0x3   :  { %13 = vsyncpa [#allocation4 + $0x1], 0  ;;  %s767_s12 = smov 0   ;;  %s769_s13 = smov 0  }
   0x4   :  { %s771_s14 = smov 0   ;;  %s773_s15 = smov 0  }
   0x5 LB: > { %s788_s16 = sadd.s32 4294967295, %s735_s15   ;;  %s499_s17 = sadd.s32 4294967294, %s735_s15   ;;  %s735_s15 = sphi %s773_s15, %s1063_s15   ;;  %s731_s14 = sphi %s771_s14, %s1062_s14   ;;  %s727_s13 = sphi %s769_s13, %s1061_s13   ;;  %s723_s12 = sphi %s767_s12, %s1060_s12  }
   0x6   : > { %s792_s18 = sadd.s32 1, %s735_s15   ;;  %s47_s19 = sadd.s32 1, %s731_s14 }
   0x7   : > { %s44_s20 = ssub.s32 %s735_s15, %s792_s18  ;;  %p54_p0 = scmp.ne.s32.totalorder %s731_s14, %s727_s13 }
   0x8   : > { %p45_p1 = scmp.eq.s32.totalorder %s44_s20, 0  ;;  %p55_p2 = scmp.eq.s32.totalorder %s735_s15, 0 }
   0x9   : > { %p60_p3 = scmp.ne.s32.totalorder %s727_s13, %s723_s12  ;;  %p61_p4 = scmp.eq.s32.totalorder %s788_s16, 0 }
   0xa   : > { %s804_s21 = scalar_select %p45_p1, %s731_s14, %s47_s19  }
   0xb   : > { %p806_p5 = por %p55_p2, %p54_p0  ;;  %p810_p6 = por %p61_p4, %p60_p3 }
   0xc   : > { %p105_p7 = scmp.eq.s32.totalorder %s788_s16, 3  ;;  %p111_p8 = scmp.eq.s32.totalorder %s499_s17, 3 }
   0xd   : > { %p558_p9 = scmp.lt.s32.totalorder %s735_s15, 4  ;;  %s137_s26 = sand.u32 1, %s731_s14  }
   0xe   : > { %p816_p10 = por %p105_p7, %p54_p0  ;;  %p820_p11 = por %p111_p8, %p60_p3 }
   0xf   : > { %s516_s27 = sshll.u32 %s735_s15, 11  ;;  %s502_s28 = sshll.u32 %s137_s26, 7 }
  0x10   : > { %s1055_s24 = scalar_select %p816_p10, 1, 0 }
  0x11   : > { %s1056_s25 = scalar_select %p820_p11, 1, 0 }
  0x12   : > { %s829_s4 = scalar_lea.hbm %s1049_s1, %s516_s27  ;;  %s141_s5 = scalar_lea.vmem [#allocation2], %s502_s28 }
  0x13   : > { %s148_s6 = sshll.u32 %s141_s5, 4  ;;  %p833_p12 = pnand %p558_p9, %p806_p5  ;;  %s837_s6 = int_to_ptr.vmem [resolvable:$true] %s148_s6 }
  0x14   : > { %s839_s8 = scalar_lea.sflag [#allocation3], %s137_s26  ;;  %s639_s9 = scalar_lea.hbm %s829_s4, 2048 }
  0x15   : > { %p640_p13 = scmp.ne.s32.totalorder %s829_s4, %s639_s9  ;;  %p641_p0 = pneg %p833_p12 }
  0x16   : > { %s644_s17 = scalar_lea.hbm %s1049_s1, 8192  ;;  %p645_p3 = scmp.lt.u32.totalorder %s829_s4, %s1049_s1 }
  0x17   : > { %p642_p1 = pnand %p641_p0, %p640_p13  ;;  %p646_p4 = scmp.lt.u32.totalorder %s644_s17, %s639_s9 }
  0x18   : > { %p648_p7 = scmp.lt.u32.totalorder %s639_s9, %s829_s4 }
  0x19   : > { %p643_p2 = pneg %p642_p1  ;;  %p647_p5 = por %p646_p4, %p645_p3 }
  0x1b   : > { %p649_p8 = por %p648_p7, %p647_p5 }
  0x1d   : > { %p650_p9 = pnand %p649_p8, %p643_p2 }
  0x1f   : > { %653 = shalt.err (!%p650_p9)
}
  0x20   : > { %s654_s22 = scalar_lea.vmem %s837_s6, 2048  ;;  %s737_s26 = smov [#allocation2]  }
  0x21   : > { %p655_p13 = scmp.ne.s32.totalorder %s837_s6, %s654_s22  ;;  %s659_s27 = sshll.u32 %s737_s26, 4  ;;  %s660_s27 = int_to_ptr.vmem [resolvable:$false] %s659_s27 }
  0x22   : > { %s661_s28 = scalar_lea.vmem %s660_s27, 4096  ;;  %p662_p10 = scmp.lt.s32.totalorder %s837_s6, %s660_s27 }
  0x23   : > { %p657_p1 = pnand %p655_p13, %p641_p0  ;;  %p663_p3 = scmp.lt.s32.totalorder %s661_s28, %s654_s22 }
  0x25   : > { %p658_p11 = pneg %p657_p1  ;;  %p664_p4 = por %p663_p3, %p662_p10 }
  0x27   : > { %p665_p5 = pnand %p664_p4, %p658_p11 }
  0x29   : > { %668 = shalt.err (!%p665_p5)
}
  0x2a   : > { %s738_s29 = smov 128   ;;  %s739_s30 = smov 8  }
  0x2b   : > { %553 = dma.hbm_to_vmem [thread:$0]  (!%p833_p12), %s829_s4, 2048, %s837_s6, %s839_s8, %s738_s29, %s738_s29, %s739_s30  }
  0x2c   : > { %p505_p0 = scmp.ge.s32.totalorder %s735_s15, 1  ;;  %p156_p2 = scmp.lt.s32.totalorder %s735_s15, 5 }
  0x2e   : > { %p157_p7 = pnand %p505_p0, %p156_p2 }
  0x2f   : > { %s870_s5 = sand.u32 (!%p157_p7), 1, %s727_s13  }
  0x30   : > { %160 = sbr.rel (%p157_p7) target bundleno = 542 (0x21e), region = 32  ;;  %s506_s9 = sshll.u32 (!%p157_p7), %s870_s5, 7 }
  0x31   : > { %s163_s10 = scalar_lea.sflag (!%p157_p7), [#allocation3], %s870_s5  ;;  %s874_s11 = scalar_lea.vmem (!%p157_p7), [#allocation2], %s506_s9 }
  0x37   : > { %714 = dma.done.wait (%p810_p6), %s163_s10, 2048  }
  0x38   : > { %716 = vsyncadd (%p810_p6), %s163_s10, 4294965248  ;;  %v881_v0 = vld [vmem:[%s874_s11] sm:$0xff]  ;;  %v884_v1 = vld [vmem:[%s874_s11 + $0x10] sm:$0xff]  ;;  %v740_v32 = vmov 0.0   ;;  %vm741_vm0 = vmmov 0   ;;  %v742_v35 = vmov 0  }
  0x39   : > { %v887_v2 = vld [vmem:[%s874_s11 + $0x8] sm:$0xff]  ;;  %v207_v3 = vmul.f32 %v881_v0, %v881_v0  ;;  %v209_v4 = vmul.f32 %v884_v1, %v884_v1  ;;  %v894_v5 = vld [vmem:[%s874_s11 + $0x18] sm:$0xff]  ;;  %v904_v9 = vld [vmem:[%s874_s11 + $0x20] sm:$0xff]  ;;  %526 = vmatprep.subr.bf16.mxu0 %v740_v32  ;;  %542 = vmatprep.mubr.msk.bf16.mxu0 %vm741_vm0, %v740_v32  ;;  %s509_s19 = sshll.u32 %s788_s16, 7  ;;  %s507_s20 = sshll.u32 %s870_s5, 4 }
  0x3a   : > { %v208_v6 = vmul.f32 %v887_v2, %v887_v2  ;;  %v210_v7 = vmul.f32 %v894_v5, %v894_v5  ;;  %v901_v8 = vld [vmem:[%s874_s11 + $0x28] sm:$0xff]  ;;  %v211_v11 = vmul.f32 %v904_v9, %v904_v9  ;;  %v911_v12 = vld [vmem:[%s874_s11 + $0x38] sm:$0xff]  ;;  %v914_v13 = vld [vmem:[%s874_s11 + $0x30] sm:$0xff]  ;;  %600 = vset.pattern.permute.xlu0 %v742_v35  ;;  %601 = vset.pattern.permute.xlu1 %v742_v35  ;;  %s188_s22 = scalar_lea.vmem [#allocation5], %s507_s20  ;;  %s1003_s29 = scalar_lea.hbm %s1051_s3, %s509_s19 }
  0x3b   : > { %223 = vadd.xlane.f32.xlu0 %v207_v3  ;;  %227 = vadd.xlane.f32.xlu1 %v209_v4  ;;  %v212_v10 = vmul.f32 %v901_v8, %v901_v8  ;;  %v214_v14 = vmul.f32 %v911_v12, %v911_v12  ;;  %v213_v15 = vmul.f32 %v914_v13, %v914_v13  ;;  %v921_v16 = vld [vmem:[%s874_s11 + $0x48] sm:$0xff]  ;;  %v924_v17 = vld [vmem:[%s874_s11 + $0x40] sm:$0xff]  ;;  %v931_v20 = vld [vmem:[%s874_s11 + $0x58] sm:$0xff]  ;;  %s426_s26 = sshll.u32 %s188_s22, 4  ;;  %s414_s30 = scalar_lea.sflag [#allocation4], %s870_s5  ;;  %s1005_s26 = int_to_ptr.vmem [resolvable:$true] %s426_s26 }
  0x3c   : > { %v216_v18 = vmul.f32 %v921_v16, %v921_v16  ;;  %v215_v19 = vmul.f32 %v924_v17, %v924_v17  ;;  %v934_v21 = vld [vmem:[%s874_s11 + $0x50] sm:$0xff]  ;;  %v218_v22 = vmul.f32 %v931_v20, %v931_v20  ;;  %v941_v24 = vld [vmem:[%s874_s11 + $0x68] sm:$0xff]  ;;  %v944_v25 = vld [vmem:[%s874_s11 + $0x60] sm:$0xff]  ;;  %s669_s9 = scalar_lea.vmem %s1005_s26, 256  ;;  %p1058_p10 = scmp.ne.s32.totalorder %s1055_s24, 0 }
  0x3d   : > { %v217_v23 = vmul.f32 %v934_v21, %v934_v21  ;;  %v220_v26 = vmul.f32 %v941_v24, %v941_v24  ;;  %v219_v27 = vmul.f32 %v944_v25, %v944_v25  ;;  %v951_v28 = vld [vmem:[%s874_s11 + $0x78] sm:$0xff]  ;;  %v954_v29 = vld [vmem:[%s874_s11 + $0x70] sm:$0xff]  ;;  %v361_v33 = vld [vmem:[%s1050_s2] sm:$0xff]  ;;  %p670_p6 = scmp.ne.s32.totalorder %s1005_s26, %s669_s9  ;;  %s743_s16 = smov [#allocation5]  }
  0x3e   : > { %v222_v30 = vmul.f32 %v951_v28, %v951_v28  ;;  %v221_v31 = vmul.f32 %v954_v29, %v954_v29  ;;  %v362_v34 = vld [vmem:[%s1050_s2 + $0x8] sm:$0xff]  ;;  %s673_s10 = sshll.u32 %s743_s16, 4  ;;  %s674_s10 = int_to_ptr.vmem [resolvable:$false] %s673_s10 }
  0x3f   : > { %225 = vadd.xlane.f32.xlu0 %v208_v6  ;;  %229 = vadd.xlane.f32.xlu1 %v210_v7  ;;  %p671_p11 = pnand %p670_p6, %p1058_p10  ;;  %s675_s11 = scalar_lea.vmem %s674_s10, 512 }
  0x40   : > { %p676_p8 = scmp.lt.s32.totalorder %s1005_s26, %s674_s10  ;;  %p677_p9 = scmp.lt.s32.totalorder %s675_s11, %s669_s9 }
  0x41   : > { %p672_p12 = pneg %p671_p11 }
  0x42   : > { %p678_p13 = por %p677_p9, %p676_p8 }
  0x43   : > { %233 = vadd.xlane.f32.xlu1 %v212_v10  ;;  %231 = vadd.xlane.f32.xlu0 %v211_v11 }
  0x44   : > { %p679_p1 = pnand %p678_p13, %p672_p12 }
  0x47   : > { %237 = vadd.xlane.f32.xlu1 %v214_v14  ;;  %235 = vadd.xlane.f32.xlu0 %v213_v15 }
  0x4b   : > { %241 = vadd.xlane.f32.xlu1 %v216_v18  ;;  %239 = vadd.xlane.f32.xlu0 %v215_v19 }
  0x4f   : > { %245 = vadd.xlane.f32.xlu1 %v218_v22  ;;  %243 = vadd.xlane.f32.xlu0 %v217_v23 }
  0x53   : > { %249 = vadd.xlane.f32.xlu1 %v220_v26  ;;  %247 = vadd.xlane.f32.xlu0 %v219_v27 }
  0x57   : > { %253 = vadd.xlane.f32.xlu1 %v222_v30  ;;  %251 = vadd.xlane.f32.xlu0 %v221_v31 }
  0x68   : > { %405 = vperm.xlu1 %601, %v362_v34  }
  0x6d   : > { %402 = vperm.xlu0 %600, %v361_v33  }
  0xc8   : > { %v224_v36 = vpop.xlane.xlu0 %223  ;;  %v228_v37 = vpop.xlane.xlu1 %227 }
  0xc9   : > { %v255_v38 = vmax.f32 %v224_v36, 1e-24  ;;  %v257_v42 = vmax.f32 %v228_v37, 1e-24 }
  0xcb   : > { %603 = vrsqrt.f32 %v255_v38 }
  0xcc   : > { %v226_v39 = vpop.xlane.xlu0 %225  ;;  %v230_v40 = vpop.xlane.xlu1 %229 }
  0xcd   : > { %v256_v41 = vmax.f32 %v226_v39, 1e-24  ;;  %v258_v43 = vmax.f32 %v230_v40, 1e-24 }
  0xcf   : > { %605 = vrsqrt.f32 %v256_v41 }
  0xd0   : > { %v234_v44 = vpop.xlane.xlu1 %233  ;;  %607 = vrsqrt.f32 %v257_v42  ;;  %v232_v45 = vpop.xlane.xlu0 %231 }
  0xd1   : > { %609 = vrsqrt.f32 %v258_v43  ;;  %v260_v46 = vmax.f32 %v234_v44, 1e-24  ;;  %v259_v47 = vmax.f32 %v232_v45, 1e-24 }
  0xd3   : > { %611 = vrsqrt.f32 %v260_v46 }
  0xd4   : > { %613 = vrsqrt.f32 %v259_v47  ;;  %v238_v50 = vpop.xlane.xlu1 %237  ;;  %v236_v53 = vpop.xlane.xlu0 %235 }
  0xd5   : > { %v604_v48 = vpop.eup %603  ;;  %v262_v56 = vmax.f32 %v238_v50, 1e-24  ;;  %v261_v58 = vmax.f32 %v236_v53, 1e-24 }
  0xd6   : > { %v287_v51 = vmul.f32 %v604_v48, %v881_v0 }
  0xd7   : > { %615 = vrsqrt.f32 %v262_v56 }
  0xd8   : > { %617 = vrsqrt.f32 %v261_v58  ;;  %v242_v61 = vpop.xlane.xlu1 %241  ;;  %v240_v63 = vpop.xlane.xlu0 %239  ;;  %v399_v58 = vstv %s509_s19 }
  0xd9   : > { %v606_v49 = vpop.eup %605  ;;  %v264_v3 = vmax.f32 %v242_v61, 1e-24  ;;  %v263_v4 = vmax.f32 %v240_v63, 1e-24 }
  0xda   : > { %v288_v52 = vmul.f32 %v606_v49, %v887_v2  ;;  %v608_v54 = vpop.eup %607 }
  0xdb   : > { %v610_v57 = vpop.eup %609  ;;  %v289_v59 = vmul.f32 %v608_v54, %v884_v1  ;;  %619 = vrsqrt.f32 %v264_v3 }
  0xdc   : > { %v303_v55 = vpack.c.bf16 %v288_v52, %v287_v51  ;;  %v290_v60 = vmul.f32 %v610_v57, %v894_v5  ;;  %621 = vrsqrt.f32 %v263_v4  ;;  %v246_v1 = vpop.xlane.xlu1 %245  ;;  %v244_v11 = vpop.xlane.xlu0 %243 }
  0xdd   : > { %v612_v62 = vpop.eup %611  ;;  %v266_v15 = vmax.f32 %v246_v1, 1e-24  ;;  %v265_v18 = vmax.f32 %v244_v11, 1e-24 }
  0xde   : > { %527 = vmatpush3.bf16.xpose.msra.mxu0 %v303_v55  ;;  %v614_v0 = vpop.eup %613  ;;  %v304_v2 = vpack.c.bf16 %v290_v60, %v289_v59  ;;  %v292_v7 = vmul.f32 %v612_v62, %v901_v8  ;;  %v397_v55 = vlaneseq }
  0xdf   : > { %528 = vmatprep.subr.bf16.mxu0 %v740_v32  ;;  %v291_v6 = vmul.f32 %v614_v0, %v904_v9  ;;  %623 = vrsqrt.f32 %v266_v15 }
  0xe0   : > { %625 = vrsqrt.f32 %v265_v18  ;;  %v250_v8 = vpop.xlane.xlu1 %249  ;;  %v248_v26 = vpop.xlane.xlu0 %247  ;;  %v398_v56 = vand.u32 127, %v397_v55 }
  0xe1   : > { %v616_v10 = vpop.eup %615  ;;  %v305_v5 = vpack.c.bf16 %v292_v7, %v291_v6  ;;  %v268_v30 = vmax.f32 %v250_v8, 1e-24  ;;  %v267_v31 = vmax.f32 %v248_v26, 1e-24 }
  0xe2   : > { %v618_v14 = vpop.eup %617  ;;  %v294_v22 = vmul.f32 %v616_v10, %v911_v12  ;;  %v400_v0 = vadd.s32 %v399_v58, %v398_v56 }
  0xe3   : > { %v293_v19 = vmul.f32 %v618_v14, %v914_v13  ;;  %627 = vrsqrt.f32 %v268_v30 }
  0xe4   : > { %629 = vrsqrt.f32 %v267_v31  ;;  %v254_v12 = vpop.xlane.xlu1 %253  ;;  %v252_v36 = vpop.xlane.xlu0 %251 }
  0xe5   : > { %v620_v9 = vpop.eup %619  ;;  %v306_v23 = vpack.c.bf16 %v294_v22, %v293_v19  ;;  %v270_v38 = vmax.f32 %v254_v12, 1e-24  ;;  %v269_v39 = vmax.f32 %v252_v36, 1e-24 }
  0xe6   : > { %529 = vmatpush3.bf16.xpose.msra.mxu0 %v304_v2  ;;  %v622_v27 = vpop.eup %621  ;;  %v296_v34 = vmul.f32 %v620_v9, %v921_v16 }
  0xe7   : > { %530 = vmatprep.subr.bf16.mxu0 %v740_v32  ;;  %v295_v33 = vmul.f32 %v622_v27, %v924_v17  ;;  %631 = vrsqrt.f32 %v270_v38 }
  0xe8   : > { %633 = vrsqrt.f32 %v269_v39  ;;  %v406_v18 = vpop.permute.xlu1 %405 }
  0xe9   : > { %v624_v13 = vpop.eup %623  ;;  %v307_v35 = vpack.c.bf16 %v296_v34, %v295_v33  ;;  %vm408_vm7 = vcmp.eq.s32.totalorder %v400_v0, %v406_v18 }
  0xea   : > { %v626_v37 = vpop.eup %625  ;;  %v298_v41 = vmul.f32 %v624_v13, %v931_v20 }
  0xeb   : > { %v297_v40 = vmul.f32 %v626_v37, %v934_v21 }
  0xec   : > { %v403_v4 = vpop.permute.xlu0 %402 }
  0xed   : > { %v628_v16 = vpop.eup %627  ;;  %v308_v17 = vpack.c.bf16 %v298_v41, %v297_v40  ;;  %vm407_vm5 = vcmp.eq.s32.totalorder %v400_v0, %v403_v4 }
  0xee   : > { %531 = vmatpush3.bf16.xpose.msra.mxu0 %v305_v5  ;;  %v630_v42 = vpop.eup %629  ;;  %v300_v44 = vmul.f32 %v628_v16, %v941_v24 }
  0xef   : > { %532 = vmatprep.subr.bf16.mxu0 %v740_v32  ;;  %v299_v43 = vmul.f32 %v630_v42, %v944_v25  ;;  %v602_v25 = vld [vmem:[%s1048_s0] sm:$0xff]  }
  0xf1   : > { %v632_v45 = vpop.eup %631  ;;  %v309_v46 = vpack.c.bf16 %v300_v44, %v299_v43 }
  0xf2   : > { %v634_v47 = vpop.eup %633  ;;  %v302_v21 = vmul.f32 %v632_v45, %v951_v28 }
  0xf3   : > { %v301_v20 = vmul.f32 %v634_v47, %v954_v29 }
  0xf5   : > { %v310_v48 = vpack.c.bf16 %v302_v21, %v301_v20 }
  0xf6   : > { %533 = vmatpush3.bf16.xpose.msra.mxu0 %v306_v23 }
  0xf7   : > { %534 = vmatprep.subr.bf16.mxu0 %v740_v32 }
  0xfe   : > { %535 = vmatpush3.bf16.xpose.msra.mxu0 %v307_v35 }
  0xff   : > { %536 = vmatprep.subr.bf16.mxu0 %v740_v32 }
 0x106   : > { %537 = vmatpush3.bf16.xpose.msra.mxu0 %v308_v17 }
 0x107   : > { %538 = vmatprep.subr.bf16.mxu0 %v740_v32 }
 0x10e   : > { %539 = vmatpush3.bf16.xpose.msra.mxu0 %v309_v46 }
 0x10f   : > { %540 = vmatprep.subr.bf16.mxu0 %v740_v32 }
 0x116   : > { %541 = vmatpush3.bf16.xpose.msra.mxu0 %v310_v48 }
 0x11d   : > { %543 = vmatmul.mubr.bf16.vlgmr.msra.gmra.mrb[0].mxu0 %v602_v25 }
 0x1f0   : > { %v353_v24 = vpop.f32.mrb[0].mxu0 }
 0x1f1   : > { %v363_v49 = vmul.f32 %v353_v24, %v353_v24  ;;  %v544_v50 = vpop.f32.mrb[1].mxu0  ;;  %v383_v63 = vmul.f32 30.0, %v353_v24  ;;  %v385_v6 = vmul.f32 26.327477, %v353_v24  ;;  %vm391_vm6 = vcmp.gt.f32.partialorder %v353_v24, -0.87758255 }
 0x1f2   : > { %v356_v51 = vpop.f32.mrb[2].mxu0 }
 0x1f3   : > { %v365_v52 = vsub.f32 1.0, %v363_v49  ;;  %v364_v29 = vmul.f32 %v356_v51, %v356_v51  ;;  %v545_v53 = vpop.f32.mrb[3].mxu0  ;;  %v384_v5 = vmul.f32 30.0, %v356_v51  ;;  %v510_v14 = vadd.f32 -7.191383, %v383_v63 }
 0x1f4   : > { %v386_v19 = vmul.f32 26.327477, %v356_v51  ;;  %vm392_vm8 = vcmp.gt.f32.partialorder %v356_v51, -0.87758255 }
 0x1f5   : > { %v367_v28 = vmax.f32 %v365_v52, 0.0  ;;  %v366_v54 = vsub.f32 1.0, %v364_v29  ;;  %v511_v23 = vadd.f32 -7.191383, %v384_v5 }
 0x1f7   : > { %635 = vrsqrt.f32 %v367_v28  ;;  %v368_v32 = vmax.f32 %v366_v54, 0.0  ;;  %vm371_vm1 = vcmp.eq.f32.partialorder %v367_v28, inf  ;;  %v374_v60 = vand.u32 2147483648, %v367_v28 }
 0x1f8   : > { %vm373_vm2 = vcmp.eq.f32.partialorder %v367_v28, 0.0 }
 0x1f9   : > { %637 = vrsqrt.f32 %v368_v32  ;;  %vm378_vm3 = vcmp.eq.f32.partialorder %v368_v32, inf  ;;  %v381_v1 = vand.u32 2147483648, %v368_v32  ;;  %vm380_vm4 = vcmp.eq.f32.partialorder %v368_v32, 0.0 }
 0x201   : > { %v636_v57 = vpop.eup %635 }
 0x202   : > { %v370_v59 = vmul.f32 %v636_v57, %v367_v28 }
 0x203   : > { %v638_v61 = vpop.eup %637 }
 0x204   : > { %v372_v62 = vsel %vm371_vm1, %v367_v28, %v370_v59  ;;  %v377_v3 = vmul.f32 %v638_v61, %v368_v32 }
 0x205   : > { %v375_v2 = vsel %vm373_vm2, %v374_v60, %v372_v62 }
 0x206   : > { %v387_v7 = vmul.f32 14.382766, %v375_v2  ;;  %v379_v10 = vsel %vm378_vm3, %v368_v32, %v377_v3 }
 0x207   : > { %v382_v15 = vsel %vm380_vm4, %v381_v1, %v379_v10 }
 0x208   : > { %v389_v11 = vsub.f32 %v385_v6, %v387_v7  ;;  %v388_v22 = vmul.f32 14.382766, %v382_v15 }
 0x20a   : > { %v395_v8 = vsel %vm391_vm6, %v389_v11, %v510_v14  ;;  %v390_v9 = vsub.f32 %v386_v19, %v388_v22 }
 0x20b   : > { %v409_v26 = vsel %vm407_vm5, %v395_v8, %v383_v63 }
 0x20c   : > { %411 = vst [vmem:[%s188_s22] sm:$0xff] %v409_v26  ;;  %v396_v27 = vsel %vm392_vm8, %v390_v9, %v511_v23 }
 0x20d   : > { %v410_v30 = vsel %vm408_vm7, %v396_v27, %v384_v5 }
 0x20e   : > { %412 = vst [vmem:[%s188_s22 + $0x8] sm:$0xff] %v410_v30 }
 0x20f   : > { %682 = shalt.err (!%p679_p1)
}
 0x210   : > { %s683_s23 = scalar_lea.hbm %s1003_s29, 256  ;;  %s687_s7 = scalar_lea.hbm %s1051_s3, 1024 }
 0x211   : > { %p684_p3 = scmp.ne.s32.totalorder %s1003_s29, %s683_s23  ;;  %p688_p0 = scmp.lt.u32.totalorder %s1003_s29, %s1051_s3 }
 0x212   : > { %p689_p2 = scmp.lt.u32.totalorder %s687_s7, %s683_s23  ;;  %p691_p6 = scmp.lt.u32.totalorder %s683_s23, %s1003_s29 }
 0x213   : > { %p685_p4 = pnand %p684_p3, %p1058_p10 }
 0x214   : > { %p690_p7 = por %p689_p2, %p688_p0 }
 0x215   : > { %p686_p5 = pneg %p685_p4 }
 0x216   : > { %p692_p11 = por %p691_p6, %p690_p7 }
 0x218   : > { %p693_p12 = pnand %p692_p11, %p686_p5 }
 0x21a   : > { %696 = shalt.err (!%p693_p12)
}
 0x21b   : > { %s744_s19 = smov 128   ;;  %s745_s20 = smov 512  }
 0x21c   : > { %s746_s22 = smov 8  }
 0x21d   : > { %548 = dma.vmem_to_hbm [thread:$0]  (%p1058_p10), %s1005_s26, 256, %s1003_s29, %s414_s30, %s744_s19, %s745_s20, %s746_s22  }
 0x21e PF: > { %p559_p8 = scmp.ge.s32.totalorder %s735_s15, 2  ;;  %s441_s27 = sand.u32 1, %s723_s12  }
 0x21f   : > { %p1059_p9 = scmp.ne.s32.totalorder %s1056_s25, 0  ;;  %s442_s28 = scalar_lea.sflag [#allocation4], %s441_s27 }
 0x221   : > { %p555_p13 = pnand %p559_p8, %p1059_p9 }
 0x223   : > { %718 = dma.done.wait (!%p555_p13), %s442_s28, 256  }
 0x224   : > { %720 = vsyncadd (!%p555_p13), %s442_s28, 4294967040  ;;  %p16_p1 = scmp.ge.s32.totalorder %s792_s18, 6   ;;  %s1060_s12 = smov %s727_s13 }
 0x225   : > { %s1061_s13 = smov %s731_s14  ;;  %s1062_s14 = smov %s804_s21 }
 0x226   : > { %s1063_s15 = smov %s792_s18  ;;  %18 = sbr.rel (!%p16_p1) target bundleno = 5 (0x5), region = 77 }
 0x22d   :  { %447 = vsyncpa [#allocation3], 1 }
 0x22e   :  { %449 = vsyncpa [#allocation3 + $0x1], 1 }
 0x22f   :  { %450 = vsyncpa [#allocation4], 1 }
 0x230   :  { %452 = vsyncpa [#allocation4 + $0x1], 1 }

</bundles_post_ra>
